<compile_context>
chip_gen: v7x
topology: tpu7x:2x2x1
jax: 0.10.0
libtpu: 0.0.40
codegen_flags: <defaults>
</compile_context>

<pallas_src>
import functools

import jax
import jax.numpy as jnp
from jax import lax
from jax.experimental import pallas as pl
from jax.experimental.pallas import tpu as pltpu


def _round_up(x, mult):
    return (x + mult - 1) // mult * mult


def _circle_loss_kernel(itab_ref, jtab_ref,               # scalar-prefetch (SMEM)
                        xrow_ref, xcolT_ref, lrow_ref, lcol_ref,   # inputs (VMEM)
                        out_ref,                                   # output (VMEM)
                        m_p_ref, s_p_ref, m_n_ref, s_n_ref,        # scratch (VMEM)
                        *, n, blk, m, gamma):
    k = pl.program_id(0)
    last = pl.num_programs(0) - 1
    i = itab_ref[k]                       # row-block index
    j = jtab_ref[k]                       # col-block index (j >= i by construction)

    @pl.when(k == 0)
    def _init():
        m_p_ref[...] = jnp.full((1, 1), -jnp.inf, jnp.float32)
        s_p_ref[...] = jnp.zeros((1, 1), jnp.float32)
        m_n_ref[...] = jnp.full((1, 1), -jnp.inf, jnp.float32)
        s_n_ref[...] = jnp.zeros((1, 1), jnp.float32)

    # (blk, D) x (D, blk) -> (blk, blk) similarity tile on the MXU (f32 accumulate).
    sim = lax.dot_general(
        xrow_ref[...], xcolT_ref[...],
        dimension_numbers=(((1,), (0,)), ((), ())),
        preferred_element_type=jnp.float32,
    )

    # Per-tile masks from iota + global offsets (no N x N materialization).
    row0 = i * blk
    col0 = j * blk
    rr = lax.broadcasted_iota(jnp.int32, (blk, blk), 0) + row0
    cc = lax.broadcasted_iota(jnp.int32, (blk, blk), 1) + col0
    # cc > rr already implies rr < n whenever cc < n, so one bound check suffices.
    valid_upper = jnp.logical_and(cc > rr, cc < n)
    label_eq = lcol_ref[...] == lrow_ref[...]              # (blk,1)==(1,blk) -> (blk,blk)
    pos_mask = jnp.logical_and(label_eq, valid_upper)
    neg_mask = jnp.logical_and(jnp.logical_not(label_eq), valid_upper)

    m_f = jnp.float32(m)
    g_f = jnp.float32(gamma)
    ap = jnp.maximum(1.0 + m_f - sim, 0.0)                 # clamp_min(-sp + 1 + m, 0)
    an = jnp.maximum(sim + m_f, 0.0)                       # clamp_min(sn + m, 0)
    logit_p = -ap * (sim - (1.0 - m_f)) * g_f
    logit_n = an * (sim - m_f) * g_f
    sel = jnp.where(label_eq, logit_p, logit_n)            # fused: one logit tile

    neg_inf = jnp.float32(-jnp.inf)
    tile_max_p = jnp.max(jnp.where(pos_mask, sel, neg_inf), keepdims=True)   # (1,1)
    tile_max_n = jnp.max(jnp.where(neg_mask, sel, neg_inf), keepdims=True)   # (1,1)

    m_p_old = m_p_ref[...]
    m_n_old = m_n_ref[...]
    m_p_new = jnp.maximum(m_p_old, tile_max_p)
    m_n_new = jnp.maximum(m_n_old, tile_max_n)
    # Rescale running sums; guard the (-inf) - (-inf) case while a class is empty.
    alpha_p = jnp.where(m_p_new == neg_inf, 0.0, jnp.exp(m_p_old - m_p_new))
    alpha_n = jnp.where(m_n_new == neg_inf, 0.0, jnp.exp(m_n_old - m_n_new))

    # Single EUP exp pass over the tile, shared by positive and negative sums.
    shift = jnp.where(label_eq, m_p_new, m_n_new)          # per-class running max
    e = jnp.exp(sel - shift)
    sum_p = jnp.sum(jnp.where(pos_mask, e, 0.0), keepdims=True)
    sum_n = jnp.sum(jnp.where(neg_mask, e, 0.0), keepdims=True)

    m_p_ref[...] = m_p_new
    m_n_ref[...] = m_n_new
    s_p_ref[...] = s_p_ref[...] * alpha_p + sum_p
    s_n_ref[...] = s_n_ref[...] * alpha_n + sum_n

    @pl.when(k == last)
    def _finalize():
        lse_p = m_p_ref[...] + jnp.log(s_p_ref[...])       # -inf if no positive pairs
        lse_n = m_n_ref[...] + jnp.log(s_n_ref[...])       # -inf if no negative pairs
        z = lse_p + lse_n
        # softplus(z), numerically stable; softplus(-inf) == 0 matches PyTorch.
        out_ref[...] = jnp.maximum(z, 0.0) + jnp.log1p(jnp.exp(-jnp.abs(z)))


def circle_loss(feats, labels, *, m=0.25, gamma=256.0, block_size=256,
                matmul_dtype=jnp.float32):
    n, d = feats.shape

    # Hoisted L2 normalization (F.normalize semantics, eps=1e-12), done once.
    x = feats.astype(jnp.float32)
    norm = jnp.sqrt(jnp.sum(x * x, axis=1, keepdims=True))
    xn = x / jnp.maximum(norm, jnp.float32(1e-12))

    # Tile sizing: lane dim of a tiled block must be a multiple of 128 (or the
    # full padded extent when a single tile covers the whole axis).
    if n <= block_size:
        blk = _round_up(max(n, 8), 8)
        n_pad = blk
    else:
        blk = max(128, _round_up(block_size, 128))
        n_pad = _round_up(n, blk)
    pad = n_pad - n

    xn_p = jnp.pad(xn, ((0, pad), (0, 0)))
    xmm = xn_p.astype(matmul_dtype)        # [n_pad, D] row operand
    xmm_t = xmm.T                          # [D, n_pad] pre-transposed col operand
    lab = jnp.pad(labels.astype(jnp.int32), (0, pad), constant_values=-1)
    lrow = lab.reshape(1, n_pad)
    lcol = lab.reshape(n_pad, 1)

    # Triangular tile schedule: only (i, j) with j >= i, row-major so the row
    # block is re-fetched only at row-block boundaries.
    t = n_pad // blk
    pairs = [(i, j) for i in range(t) for j in range(i, t)]
    itab = jnp.asarray([p[0] for p in pairs], dtype=jnp.int32)
    jtab = jnp.asarray([p[1] for p in pairs], dtype=jnp.int32)
    nsteps = len(pairs)

    grid_spec = pltpu.PrefetchScalarGridSpec(
        num_scalar_prefetch=2,
        grid=(nsteps,),
        in_specs=[
            pl.BlockSpec((blk, d), lambda k, it, jt: (it[k], 0)),   # row block
            pl.BlockSpec((d, blk), lambda k, it, jt: (0, jt[k])),   # col block (pre-T)
            pl.BlockSpec((1, blk), lambda k, it, jt: (0, jt[k])),   # labels (cols)
            pl.BlockSpec((blk, 1), lambda k, it, jt: (it[k], 0)),   # labels (rows)
        ],
        out_specs=pl.BlockSpec((1, 1), lambda k, it, jt: (0, 0)),
        scratch_shapes=[
            pltpu.VMEM((1, 1), jnp.float32),   # running max (pos)
            pltpu.VMEM((1, 1), jnp.float32),   # running sum (pos)
            pltpu.VMEM((1, 1), jnp.float32),   # running max (neg)
            pltpu.VMEM((1, 1), jnp.float32),   # running sum (neg)
        ],
    )

    out = pl.pallas_call(
        functools.partial(_circle_loss_kernel, n=n, blk=blk, m=m, gamma=gamma),
        out_shape=jax.ShapeDtypeStruct((1, 1), jnp.float32),
        grid_spec=grid_spec,
        compiler_params=pltpu.CompilerParams(
            dimension_semantics=("arbitrary",),      # sequential online accumulation
            vmem_limit_bytes=32 * 1024 * 1024,
        ),
    )(itab, jtab, xmm, xmm_t, lrow, lcol)
    return out[0, 0]


def _reference_circle_loss(feats, labels, *, m=0.25, gamma=256.0):
    # Pure-JAX reference mirroring the PyTorch code (for a sanity check).
    x = feats / jnp.maximum(jnp.linalg.norm(feats, axis=1, keepdims=True), 1e-12)
    sim = x @ x.T
    label_eq = labels[:, None] == labels[None, :]
    upper = jnp.triu(jnp.ones_like(sim, dtype=bool), k=1)
    pos_mask = label_eq & upper
    neg_mask = (~label_eq) & upper
    ap = jnp.maximum(-sim + 1 + m, 0.0)
    an = jnp.maximum(sim + m, 0.0)
    logit_p = -ap * (sim - (1 - m)) * gamma
    logit_n = an * (sim - m) * gamma
    lse_p = jax.scipy.special.logsumexp(jnp.where(pos_mask, logit_p, -jnp.inf))
    lse_n = jax.scipy.special.logsumexp(jnp.where(neg_mask, logit_n, -jnp.inf))
    return jax.nn.softplus(lse_n + lse_p)


if __name__ == "__main__":
    key = jax.random.PRNGKey(0)
    k1, k2 = jax.random.split(key)

    # Small single-tile case (matches the module's typical mini-batch usage).
    N1, D = 8, 32
    feats1 = jax.random.normal(k1, (N1, D), dtype=jnp.float32)
    labels1 = jnp.array([0, 0, 1, 1, 2, 2, 3, 3], dtype=jnp.int32)
    loss1 = jax.block_until_ready(circle_loss(feats1, labels1, m=0.25, gamma=256.0))
    ref1 = _reference_circle_loss(feats1, labels1, m=0.25, gamma=256.0)
    assert jnp.isfinite(loss1), "loss1 is not finite"
    assert jnp.allclose(loss1, ref1, rtol=1e-4, atol=1e-4), (loss1, ref1)

    # Multi-tile case exercising the triangular tiled grid (3x3 blocks -> 6 steps).
    N2 = 300
    feats2 = jax.random.normal(k2, (N2, D), dtype=jnp.float32)
    labels2 = jnp.arange(N2, dtype=jnp.int32) % 7
    loss2 = jax.block_until_ready(
        circle_loss(feats2, labels2, m=0.25, gamma=256.0, block_size=128))
    ref2 = _reference_circle_loss(feats2, labels2, m=0.25, gamma=256.0)
    assert jnp.isfinite(loss2), "loss2 is not finite"
    assert jnp.allclose(loss2, ref2, rtol=1e-3, atol=1e-2), (loss2, ref2)

    # Optional bf16-operand MXU path (loose tolerance: gamma amplifies bf16 sim error).
    loss2_bf16 = jax.block_until_ready(
        circle_loss(feats2, labels2, m=0.25, gamma=256.0, block_size=128,
                    matmul_dtype=jnp.bfloat16))
    assert jnp.isfinite(loss2_bf16), "bf16 loss is not finite"
    assert jnp.allclose(loss2_bf16, ref2, rtol=1e-1, atol=1.0), (loss2_bf16, ref2)

    print("KERNEL_OK")
</pallas_src>

<mosaic_0001>
module attributes {stable_mosaic.version = 11 : i64} {
  func.func @_circle_loss_kernel(%arg0: i32, %arg1: memref<1xi32, #tpu.memory_space<smem>>, %arg2: memref<1xi32, #tpu.memory_space<smem>>, %arg3: memref<8x32xf32, #tpu.memory_space<vmem>>, %arg4: memref<32x8xf32, #tpu.memory_space<vmem>>, %arg5: memref<1x8xi32, #tpu.memory_space<vmem>>, %arg6: memref<8x1xi32, #tpu.memory_space<vmem>>, %arg7: memref<1x1xf32, #tpu.memory_space<vmem>>, %arg8: memref<1x1xf32, #tpu.memory_space<vmem>>, %arg9: memref<1x1xf32, #tpu.memory_space<vmem>>, %arg10: memref<1x1xf32, #tpu.memory_space<vmem>>, %arg11: memref<1x1xf32, #tpu.memory_space<vmem>>) attributes {dimension_semantics = [#tpu.dimension_semantics<arbitrary>], iteration_bounds = array<i64: 1>, scalar_prefetch = 2 : i64, scratch_operands = 4 : i64, tpu.core_type = #tpu.core_type<tc>, window_params = [{transform_indices = @transform_0, window_bounds = array<i64: 8, 32>}, {transform_indices = @transform_1, window_bounds = array<i64: 32, 8>}, {transform_indices = @transform_2, window_bounds = array<i64: 1, 8>}, {transform_indices = @transform_3, window_bounds = array<i64: 8, 1>}, {pipeline_mode = #tpu.pipeline_mode<synchronous>, transform_indices = @transform_4, window_bounds = array<i64: 1, 1>}]} {
    %0 = arith.index_cast %arg0 : i32 to index
    %1 = memref.load %arg1[%0] : memref<1xi32, #tpu.memory_space<smem>>
    %2 = arith.index_cast %arg0 : i32 to index
    %3 = memref.load %arg2[%2] : memref<1xi32, #tpu.memory_space<smem>>
    %c0_i32 = arith.constant 0 : i32
    %4 = arith.cmpi eq, %arg0, %c0_i32 : i32
    %5 = arith.extui %4 : i1 to i32
    %c0_i32_0 = arith.constant 0 : i32
    %6 = arith.cmpi ne, %5, %c0_i32_0 : i32
    scf.if %6 {
      %cst_52 = arith.constant 0xFF800000 : f32
      %117 = vector.broadcast %cst_52 : f32 to vector<1x1xf32>
      %c0_53 = arith.constant 0 : index
      %c0_54 = arith.constant 0 : index
      %118 = vector.load %arg8[%c0_53, %c0_54] : memref<1x1xf32, #tpu.memory_space<vmem>>, vector<1x1xf32>
      tpu.vector_store %arg8[%c0_53, %c0_54], %117 {strides = array<i32>} : memref<1x1xf32, #tpu.memory_space<vmem>>, vector<1x1xf32>,
      %cst_55 = arith.constant 0.000000e+00 : f32
      %119 = vector.broadcast %cst_55 : f32 to vector<1x1xf32>
      %c0_56 = arith.constant 0 : index
      %c0_57 = arith.constant 0 : index
      %120 = vector.load %arg9[%c0_56, %c0_57] : memref<1x1xf32, #tpu.memory_space<vmem>>, vector<1x1xf32>
      tpu.vector_store %arg9[%c0_56, %c0_57], %119 {strides = array<i32>} : memref<1x1xf32, #tpu.memory_space<vmem>>, vector<1x1xf32>,
      %cst_58 = arith.constant 0xFF800000 : f32
      %121 = vector.broadcast %cst_58 : f32 to vector<1x1xf32>
      %c0_59 = arith.constant 0 : index
      %c0_60 = arith.constant 0 : index
      %122 = vector.load %arg10[%c0_59, %c0_60] : memref<1x1xf32, #tpu.memory_space<vmem>>, vector<1x1xf32>
      tpu.vector_store %arg10[%c0_59, %c0_60], %121 {strides = array<i32>} : memref<1x1xf32, #tpu.memory_space<vmem>>, vector<1x1xf32>,
      %cst_61 = arith.constant 0.000000e+00 : f32
      %123 = vector.broadcast %cst_61 : f32 to vector<1x1xf32>
      %c0_62 = arith.constant 0 : index
      %c0_63 = arith.constant 0 : index
      %124 = vector.load %arg11[%c0_62, %c0_63] : memref<1x1xf32, #tpu.memory_space<vmem>>, vector<1x1xf32>
      tpu.vector_store %arg11[%c0_62, %c0_63], %123 {strides = array<i32>} : memref<1x1xf32, #tpu.memory_space<vmem>>, vector<1x1xf32>,
    } else {
    }
    %c0 = arith.constant 0 : index
    %c0_1 = arith.constant 0 : index
    %7 = vector.load %arg3[%c0, %c0_1] : memref<8x32xf32, #tpu.memory_space<vmem>>, vector<8x32xf32>
    %c0_2 = arith.constant 0 : index
    %c0_3 = arith.constant 0 : index
    %8 = vector.load %arg4[%c0_2, %c0_3] : memref<32x8xf32, #tpu.memory_space<vmem>>, vector<32x8xf32>
    %cst = arith.constant dense<0.000000e+00> : vector<8x8xf32>
    %9 = tpu.matmul %7, %8, %cst {dimension_numbers = #tpu.dot_dimension_numbers<[1], [0], [0], [1], [0, 0, 1, 1], [], []>} : vector<8x32xf32>, vector<32x8xf32>, vector<8x8xf32> -> vector<8x8xf32>
    %c8_i32 = arith.constant 8 : i32
    %10 = arith.muli %1, %c8_i32 : i32
    %c8_i32_4 = arith.constant 8 : i32
    %11 = arith.muli %3, %c8_i32_4 : i32
    %12 = tpu.iota {dimensions = array<i32: 0>} : vector<8x8xi32>
    %13 = vector.broadcast %10 : i32 to vector<8x8xi32>
    %14 = arith.addi %12, %13 : vector<8x8xi32>
    %15 = tpu.iota {dimensions = array<i32: 1>} : vector<8x8xi32>
    %16 = vector.broadcast %11 : i32 to vector<8x8xi32>
    %17 = arith.addi %15, %16 : vector<8x8xi32>
    %18 = arith.cmpi sgt, %17, %14 : vector<8x8xi32>
    %c8_i32_5 = arith.constant 8 : i32
    %19 = vector.broadcast %c8_i32_5 : i32 to vector<8x8xi32>
    %20 = arith.cmpi slt, %17, %19 : vector<8x8xi32>
    %21 = arith.andi %18, %20 : vector<8x8xi1>
    %c0_6 = arith.constant 0 : index
    %c0_7 = arith.constant 0 : index
    %22 = vector.load %arg6[%c0_6, %c0_7] : memref<8x1xi32, #tpu.memory_space<vmem>>, vector<8x1xi32>
    %c0_8 = arith.constant 0 : index
    %c0_9 = arith.constant 0 : index
    %23 = vector.load %arg5[%c0_8, %c0_9] : memref<1x8xi32, #tpu.memory_space<vmem>>, vector<1x8xi32>
    %24 = vector.broadcast %22 : vector<8x1xi32> to vector<8x8xi32>
    %25 = vector.broadcast %23 : vector<1x8xi32> to vector<8x8xi32>
    %26 = arith.cmpi eq, %24, %25 : vector<8x8xi32>
    %27 = arith.andi %26, %21 : vector<8x8xi1>
    %cst_10 = arith.constant dense<true> : vector<8x8xi1>
    %28 = arith.xori %26, %cst_10 : vector<8x8xi1>
    %29 = arith.andi %28, %21 : vector<8x8xi1>
    %cst_11 = arith.constant 1.000000e+00 : f32
    %cst_12 = arith.constant 2.500000e-01 : f32
    %30 = arith.addf %cst_11, %cst_12 : f32
    %31 = vector.broadcast %30 : f32 to vector<8x8xf32>
    %32 = arith.subf %31, %9 : vector<8x8xf32>
    %cst_13 = arith.constant 0.000000e+00 : f32
    %33 = vector.broadcast %cst_13 : f32 to vector<8x8xf32>
    %34 = arith.maximumf %32, %33 : vector<8x8xf32>
    %cst_14 = arith.constant 2.500000e-01 : f32
    %35 = vector.broadcast %cst_14 : f32 to vector<8x8xf32>
    %36 = arith.addf %9, %35 : vector<8x8xf32>
    %cst_15 = arith.constant 0.000000e+00 : f32
    %37 = vector.broadcast %cst_15 : f32 to vector<8x8xf32>
    %38 = arith.maximumf %36, %37 : vector<8x8xf32>
    %cst_16 = arith.constant 0.000000e+00 : f32
    %39 = vector.broadcast %cst_16 : f32 to vector<8x8xf32>
    %40 = arith.subf %39, %34 : vector<8x8xf32>
    %cst_17 = arith.constant 1.000000e+00 : f32
    %cst_18 = arith.constant 2.500000e-01 : f32
    %41 = arith.subf %cst_17, %cst_18 : f32
    %42 = vector.broadcast %41 : f32 to vector<8x8xf32>
    %43 = arith.subf %9, %42 : vector<8x8xf32>
    %44 = arith.mulf %40, %43 : vector<8x8xf32>
    %cst_19 = arith.constant 2.560000e+02 : f32
    %45 = vector.broadcast %cst_19 : f32 to vector<8x8xf32>
    %46 = arith.mulf %44, %45 : vector<8x8xf32>
    %cst_20 = arith.constant 2.500000e-01 : f32
    %47 = vector.broadcast %cst_20 : f32 to vector<8x8xf32>
    %48 = arith.subf %9, %47 : vector<8x8xf32>
    %49 = arith.mulf %38, %48 : vector<8x8xf32>
    %cst_21 = arith.constant 2.560000e+02 : f32
    %50 = vector.broadcast %cst_21 : f32 to vector<8x8xf32>
    %51 = arith.mulf %49, %50 : vector<8x8xf32>
    %52 = arith.select %26, %46, %51 : vector<8x8xi1>, vector<8x8xf32>
    %cst_22 = arith.constant 0xFF800000 : f32
    %53 = vector.broadcast %cst_22 : f32 to vector<8x8xf32>
    %54 = arith.select %27, %52, %53 : vector<8x8xi1>, vector<8x8xf32>
    %55 = vector.shape_cast %54 : vector<8x8xf32> to vector<1x8x8xf32>
    %cst_23 = arith.constant dense<0xFF800000> : vector<1xf32>
    %56 = vector.multi_reduction <maximumf>, %55, %cst_23 [1, 2] : vector<1x8x8xf32> to vector<1xf32>
    %57 = vector.shape_cast %56 : vector<1xf32> to vector<1x1x1xf32>
    %58 = vector.extract %57[0, 0, 0] : f32 from vector<1x1x1xf32>
    %59 = vector.broadcast %58 : f32 to vector<1x1xf32>
    %cst_24 = arith.constant 0xFF800000 : f32
    %60 = vector.broadcast %cst_24 : f32 to vector<8x8xf32>
    %61 = arith.select %29, %52, %60 : vector<8x8xi1>, vector<8x8xf32>
    %62 = vector.shape_cast %61 : vector<8x8xf32> to vector<1x8x8xf32>
    %cst_25 = arith.constant dense<0xFF800000> : vector<1xf32>
    %63 = vector.multi_reduction <maximumf>, %62, %cst_25 [1, 2] : vector<1x8x8xf32> to vector<1xf32>
    %64 = vector.shape_cast %63 : vector<1xf32> to vector<1x1x1xf32>
    %65 = vector.extract %64[0, 0, 0] : f32 from vector<1x1x1xf32>
    %66 = vector.broadcast %65 : f32 to vector<1x1xf32>
    %c0_26 = arith.constant 0 : index
    %c0_27 = arith.constant 0 : index
    %67 = vector.load %arg8[%c0_26, %c0_27] : memref<1x1xf32, #tpu.memory_space<vmem>>, vector<1x1xf32>
    %c0_28 = arith.constant 0 : index
    %c0_29 = arith.constant 0 : index
    %68 = vector.load %arg10[%c0_28, %c0_29] : memref<1x1xf32, #tpu.memory_space<vmem>>, vector<1x1xf32>
    %69 = arith.maximumf %67, %59 : vector<1x1xf32>
    %70 = arith.maximumf %68, %66 : vector<1x1xf32>
    %cst_30 = arith.constant 0xFF800000 : f32
    %71 = vector.broadcast %cst_30 : f32 to vector<1x1xf32>
    %72 = arith.cmpf oeq, %69, %71 : vector<1x1xf32>
    %73 = arith.subf %67, %69 : vector<1x1xf32>
    %74 = math.exp %73 : vector<1x1xf32>
    %cst_31 = arith.constant 0.000000e+00 : f32
    %75 = vector.broadcast %cst_31 : f32 to vector<1x1xf32>
    %76 = arith.select %72, %75, %74 : vector<1x1xi1>, vector<1x1xf32>
    %cst_32 = arith.constant 0xFF800000 : f32
    %77 = vector.broadcast %cst_32 : f32 to vector<1x1xf32>
    %78 = arith.cmpf oeq, %70, %77 : vector<1x1xf32>
    %79 = arith.subf %68, %70 : vector<1x1xf32>
    %80 = math.exp %79 : vector<1x1xf32>
    %cst_33 = arith.constant 0.000000e+00 : f32
    %81 = vector.broadcast %cst_33 : f32 to vector<1x1xf32>
    %82 = arith.select %78, %81, %80 : vector<1x1xi1>, vector<1x1xf32>
    %83 = vector.shape_cast %69 : vector<1x1xf32> to vector<1x1xf32>
    %84 = vector.broadcast %83 : vector<1x1xf32> to vector<8x8xf32>
    %85 = vector.shape_cast %70 : vector<1x1xf32> to vector<1x1xf32>
    %86 = vector.broadcast %85 : vector<1x1xf32> to vector<8x8xf32>
    %87 = arith.select %26, %84, %86 : vector<8x8xi1>, vector<8x8xf32>
    %88 = arith.subf %52, %87 : vector<8x8xf32>
    %89 = math.exp %88 : vector<8x8xf32>
    %cst_34 = arith.constant 0.000000e+00 : f32
    %90 = vector.broadcast %cst_34 : f32 to vector<8x8xf32>
    %91 = arith.select %27, %89, %90 : vector<8x8xi1>, vector<8x8xf32>
    %92 = vector.shape_cast %91 : vector<8x8xf32> to vector<1x8x8xf32>
    %cst_35 = arith.constant dense<0.000000e+00> : vector<1xf32>
    %93 = vector.multi_reduction <add>, %92, %cst_35 [1, 2] : vector<1x8x8xf32> to vector<1xf32>
    %94 = vector.shape_cast %93 : vector<1xf32> to vector<1x1x1xf32>
    %95 = vector.extract %94[0, 0, 0] : f32 from vector<1x1x1xf32>
    %96 = vector.broadcast %95 : f32 to vector<1x1xf32>
    %cst_36 = arith.constant 0.000000e+00 : f32
    %97 = vector.broadcast %cst_36 : f32 to vector<8x8xf32>
    %98 = arith.select %29, %89, %97 : vector<8x8xi1>, vector<8x8xf32>
    %99 = vector.shape_cast %98 : vector<8x8xf32> to vector<1x8x8xf32>
    %cst_37 = arith.constant dense<0.000000e+00> : vector<1xf32>
    %100 = vector.multi_reduction <add>, %99, %cst_37 [1, 2] : vector<1x8x8xf32> to vector<1xf32>
    %101 = vector.shape_cast %100 : vector<1xf32> to vector<1x1x1xf32>
    %102 = vector.extract %101[0, 0, 0] : f32 from vector<1x1x1xf32>
    %103 = vector.broadcast %102 : f32 to vector<1x1xf32>
    %c0_38 = arith.constant 0 : index
    %c0_39 = arith.constant 0 : index
    %104 = vector.load %arg8[%c0_38, %c0_39] : memref<1x1xf32, #tpu.memory_space<vmem>>, vector<1x1xf32>
    tpu.vector_store %arg8[%c0_38, %c0_39], %69 {strides = array<i32>} : memref<1x1xf32, #tpu.memory_space<vmem>>, vector<1x1xf32>,
    %c0_40 = arith.constant 0 : index
    %c0_41 = arith.constant 0 : index
    %105 = vector.load %arg10[%c0_40, %c0_41] : memref<1x1xf32, #tpu.memory_space<vmem>>, vector<1x1xf32>
    tpu.vector_store %arg10[%c0_40, %c0_41], %70 {strides = array<i32>} : memref<1x1xf32, #tpu.memory_space<vmem>>, vector<1x1xf32>,
    %c0_42 = arith.constant 0 : index
    %c0_43 = arith.constant 0 : index
    %106 = vector.load %arg9[%c0_42, %c0_43] : memref<1x1xf32, #tpu.memory_space<vmem>>, vector<1x1xf32>
    %107 = arith.mulf %106, %76 : vector<1x1xf32>
    %108 = arith.addf %107, %96 : vector<1x1xf32>
    %c0_44 = arith.constant 0 : index
    %c0_45 = arith.constant 0 : index
    %109 = vector.load %arg9[%c0_44, %c0_45] : memref<1x1xf32, #tpu.memory_space<vmem>>, vector<1x1xf32>
    tpu.vector_store %arg9[%c0_44, %c0_45], %108 {strides = array<i32>} : memref<1x1xf32, #tpu.memory_space<vmem>>, vector<1x1xf32>,
    %c0_46 = arith.constant 0 : index
    %c0_47 = arith.constant 0 : index
    %110 = vector.load %arg11[%c0_46, %c0_47] : memref<1x1xf32, #tpu.memory_space<vmem>>, vector<1x1xf32>
    %111 = arith.mulf %110, %82 : vector<1x1xf32>
    %112 = arith.addf %111, %103 : vector<1x1xf32>
    %c0_48 = arith.constant 0 : index
    %c0_49 = arith.constant 0 : index
    %113 = vector.load %arg11[%c0_48, %c0_49] : memref<1x1xf32, #tpu.memory_space<vmem>>, vector<1x1xf32>
    tpu.vector_store %arg11[%c0_48, %c0_49], %112 {strides = array<i32>} : memref<1x1xf32, #tpu.memory_space<vmem>>, vector<1x1xf32>,
    %c0_i32_50 = arith.constant 0 : i32
    %114 = arith.cmpi eq, %arg0, %c0_i32_50 : i32
    %115 = arith.extui %114 : i1 to i32
    %c0_i32_51 = arith.constant 0 : i32
    %116 = arith.cmpi ne, %115, %c0_i32_51 : i32
    scf.if %116 {
      %c0_52 = arith.constant 0 : index
      %c0_53 = arith.constant 0 : index
      %117 = vector.load %arg8[%c0_52, %c0_53] : memref<1x1xf32, #tpu.memory_space<vmem>>, vector<1x1xf32>
      %c0_54 = arith.constant 0 : index
      %c0_55 = arith.constant 0 : index
      %118 = vector.load %arg9[%c0_54, %c0_55] : memref<1x1xf32, #tpu.memory_space<vmem>>, vector<1x1xf32>
      %119 = math.log %118 : vector<1x1xf32>
      %120 = arith.addf %117, %119 : vector<1x1xf32>
      %c0_56 = arith.constant 0 : index
      %c0_57 = arith.constant 0 : index
      %121 = vector.load %arg10[%c0_56, %c0_57] : memref<1x1xf32, #tpu.memory_space<vmem>>, vector<1x1xf32>
      %c0_58 = arith.constant 0 : index
      %c0_59 = arith.constant 0 : index
      %122 = vector.load %arg11[%c0_58, %c0_59] : memref<1x1xf32, #tpu.memory_space<vmem>>, vector<1x1xf32>
      %123 = math.log %122 : vector<1x1xf32>
      %124 = arith.addf %121, %123 : vector<1x1xf32>
      %125 = arith.addf %120, %124 : vector<1x1xf32>
      %cst_60 = arith.constant 0.000000e+00 : f32
      %126 = vector.broadcast %cst_60 : f32 to vector<1x1xf32>
      %127 = arith.maximumf %125, %126 : vector<1x1xf32>
      %128 = math.absf %125 : vector<1x1xf32>
      %cst_61 = arith.constant 0.000000e+00 : f32
      %129 = vector.broadcast %cst_61 : f32 to vector<1x1xf32>
      %130 = arith.subf %129, %128 : vector<1x1xf32>
      %131 = math.exp %130 : vector<1x1xf32>
      %132 = math.log1p %131 : vector<1x1xf32>
      %133 = arith.addf %127, %132 : vector<1x1xf32>
      %c0_62 = arith.constant 0 : index
      %c0_63 = arith.constant 0 : index
      %134 = vector.load %arg7[%c0_62, %c0_63] : memref<1x1xf32, #tpu.memory_space<vmem>>, vector<1x1xf32>
      tpu.vector_store %arg7[%c0_62, %c0_63], %133 {strides = array<i32>} : memref<1x1xf32, #tpu.memory_space<vmem>>, vector<1x1xf32>,
    } else {
    }
    return
  }
  func.func @transform_0(%arg0: i32, %arg1: memref<1xi32, #tpu.memory_space<smem>>, %arg2: memref<1xi32, #tpu.memory_space<smem>>) -> (i32, i32) {
    %0 = arith.index_cast %arg0 : i32 to index
    %1 = memref.load %arg1[%0] : memref<1xi32, #tpu.memory_space<smem>>
    %c0_i32 = arith.constant 0 : i32
    %c0_i32_0 = arith.constant 0 : i32
    return %1, %c0_i32 : i32, i32
  }
  func.func @transform_1(%arg0: i32, %arg1: memref<1xi32, #tpu.memory_space<smem>>, %arg2: memref<1xi32, #tpu.memory_space<smem>>) -> (i32, i32) {
    %0 = arith.index_cast %arg0 : i32 to index
    %1 = memref.load %arg2[%0] : memref<1xi32, #tpu.memory_space<smem>>
    %c0_i32 = arith.constant 0 : i32
    %c0_i32_0 = arith.constant 0 : i32
    return %c0_i32, %1 : i32, i32
  }
  func.func @transform_2(%arg0: i32, %arg1: memref<1xi32, #tpu.memory_space<smem>>, %arg2: memref<1xi32, #tpu.memory_space<smem>>) -> (i32, i32) {
    %0 = arith.index_cast %arg0 : i32 to index
    %1 = memref.load %arg2[%0] : memref<1xi32, #tpu.memory_space<smem>>
    %c0_i32 = arith.constant 0 : i32
    %c0_i32_0 = arith.constant 0 : i32
    return %c0_i32, %1 : i32, i32
  }
  func.func @transform_3(%arg0: i32, %arg1: memref<1xi32, #tpu.memory_space<smem>>, %arg2: memref<1xi32, #tpu.memory_space<smem>>) -> (i32, i32) {
    %0 = arith.index_cast %arg0 : i32 to index
    %1 = memref.load %arg1[%0] : memref<1xi32, #tpu.memory_space<smem>>
    %c0_i32 = arith.constant 0 : i32
    %c0_i32_0 = arith.constant 0 : i32
    return %1, %c0_i32 : i32, i32
  }
  func.func @transform_4(%arg0: i32, %arg1: memref<1xi32, #tpu.memory_space<smem>>, %arg2: memref<1xi32, #tpu.memory_space<smem>>) -> (i32, i32) {
    %c0_i32 = arith.constant 0 : i32
    %c0_i32_0 = arith.constant 0 : i32
    %c0_i32_1 = arith.constant 0 : i32
    return %c0_i32, %c0_i32_0 : i32, i32
  }
}

</mosaic_0001>

<bundles_post_ra>
// kernel: tpu_custom_call.1
= control target key start
LH: loop header
LB: loop body
LE: loop exit
PB: predicated region body
PF: predicated region fallthrough
CT: control target
= control target key end

     0   :  { %vm93_vm0 = vcmask 0   ;;  %v462_v0 = vmov 0.0|0.0   ;;  %v463_v1 = vmov 0.0   ;;  %vm464_vm1 = vmmov 0   ;;  %s617_s0 = inlined_call_operand.<no memory space> [shape: s32[1], index: 0, kind: input, shape index: {}]   ;;  %s618_s1 = inlined_call_operand.<no memory space> [shape: s32[1], index: 1, kind: input, shape index: {}]   ;;  %s619_s2 = inlined_call_operand.vmem [shape: f32[8,32], index: 2, kind: input, shape index: {}]   ;;  %s620_s3 = inlined_call_operand.vmem [shape: f32[32,8], index: 3, kind: input, shape index: {}]   ;;  %s621_s4 = inlined_call_operand.vmem [shape: s32[1,8], index: 4, kind: input, shape index: {}]   ;;  %s622_s5 = inlined_call_operand.vmem [shape: s32[8,1], index: 5, kind: input, shape index: {}]   ;;  %s623_s6 = inlined_call_operand.hbm [shape: f32[1,1], index: 6, kind: output, shape index: {}]  }
   0x1   :  { %p71_p0 = scmp.lt.s32.totalorder %s618_s1, 0  ;;  %p65_p1 = scmp.lt.s32.totalorder %s617_s0, 0  ;;  %401 = vmatprep.subr.bf16.mxu0 %v462_v0  ;;  %95 = vst.msk [vmem:[#allocation3] sm:$0x1] %vm93_vm0, %v463_v1  ;;  %97 = vst.msk [vmem:[#allocation5] sm:$0x1] %vm93_vm0, %v463_v1  ;;  %398 = vmatprep.mubr.msk.f32.mxu0 %vm464_vm1, %v463_v1 }
   0x2   :  { %13 = vsyncpa [#allocation10], 0  ;;  %v465_v2 = vmov 0   ;;  %vm103_vm2 = vcmask 261120   ;;  %v179_v11 = vlaneseq  ;;  %s381_s21 = sshll.u32 %s618_s1, 3  ;;  %vm466_vm7 = vmmov 1  }
   0x3   :  { %s515_s27 = scalar_select %p71_p0, %s618_s1, 0  ;;  %422 = vset.pattern.permute.xlu0 %v465_v2  ;;  %423 = vset.pattern.permute.xlu1 %v465_v2  ;;  %v185_v15 = vstv %s381_s21  ;;  %vm216_vm11 = vcmask 64512   ;;  %v467_v41 = vmov -inf  }
   0x4   :  { %s66_s30 = scalar_select %p65_p1, %s617_s0, 0  ;;  %v536_v12 = vshrl.u32 %v179_v11, 7  ;;  %v184_v13 = vand.u32 127, %v179_v11  ;;  %94 = vst.msk [vmem:[#allocation2] sm:$0x1] %vm93_vm0, %v467_v41 }
   0x5   :  { %s377_s7 = sshll.u32 %s515_s27, 3  ;;  %s79_s23 = scalar_lea.vmem %s621_s4, %s515_s27  ;;  %96 = vst.msk [vmem:[#allocation4] sm:$0x1] %vm93_vm0, %v467_v41 }
   0x6   :  { %s74_s10 = scalar_lea.vmem %s620_s3, %s377_s7  ;;  %s376_s11 = sshll.u32 %s66_s30, 3  ;;  %v186_v17 = vadd.s32 %v185_v15, %v184_v13  ;;  %v543_v18 = vld [vmem:[%s79_s23] ss:$0 sm:$0xff]  ;;  %v257_v58 = vsub.s32 0, %v536_v12 }
   0x7   :  { %v99_v3 = vld [vmem:[%s74_s10] sm:$0xff]  ;;  %v100_v4 = vld [vmem:[%s74_s10 + $0x8] sm:$0xff]  ;;  %v101_v5 = vld [vmem:[%s74_s10 + $0x10] sm:$0xff]  ;;  %s85_s14 = scalar_lea.vmem %s622_s5, %s376_s11  ;;  %s68_s3 = scalar_lea.vmem %s619_s2, %s376_s11 }
   0x8   :  { %v402_v6 = vpack.c.bf16 %v100_v4, %v99_v3  ;;  %v102_v7 = vld [vmem:[%s74_s10 + $0x18] sm:$0xff]  ;;  %v190_v8 = vld [vmem:[%s85_s14] sm:$0xff]  ;;  %s380_s5 = sshll.u32 %s617_s0, 3  ;;  %vm188_vm4 = vcmp.lt.s32.totalorder %v186_v17, 8  ;;  %s468_s25 = smov [#allocation9]  }
   0x9   :  { %193 = vperm.xlu0 %422, %v190_v8   ;;  %v405_v9 = vpack.c.bf16 %v102_v7, %v101_v5  ;;  %v98_v10 = vld [vmem:[%s68_s3] sm:$0xff]  ;;  %v181_v14 = vstv %s380_s5  ;;  %s347_s26 = sshll.u32 %s468_s25, 4  ;;  %s348_s26 = int_to_ptr.vmem [resolvable:$true] %s347_s26 }
   0xa   :  { %403 = vmatpush3.bf16.msra.mxu0 %v402_v6  ;;  %v182_v16 = vadd.s32 %v181_v14, %v536_v12  ;;  %s438_s27 = scalar_lea.vmem %s348_s26, 16  ;;  %s442_s28 = scalar_lea.vmem %s348_s26, 32 }
   0xb   :  { %404 = vmatprep.subr.bf16.mxu0 %v462_v0  ;;  %v240_v56 = vld [vmem:[#allocation2] sm:$0x1]  ;;  %p439_p2 = scmp.ne.s32.totalorder %s348_s26, %s438_s27  ;;  %p443_p3 = scmp.lt.s32.totalorder %s348_s26, %s348_s26 }
   0xc   :  { %vm187_vm3 = vcmp.gt.s32.totalorder %v186_v17, %v182_v16  ;;  %v241_v57 = vld [vmem:[#allocation4] sm:$0x1]  ;;  %p444_p4 = scmp.lt.s32.totalorder %s442_s28, %s438_s27 }
   0xd   :  { %vm549_vm6 = vmand %vm187_vm3, %vm188_vm4 }
   0xe   :  { %406 = vmatpush3.bf16.msra.mxu0 %v405_v9  ;;  %p445_p5 = por %p444_p4, %p443_p3 }
  0x10   :  { %p446_p6 = pnand %p445_p5, %p439_p2 }
  0x11   :  { %399 = vmatmul.mubr.msk.f32.vlgmr.msra.gmra.mrb[0].mxu0 %vm103_vm2, %v98_v10 }
  0x88   :  { %v545_v19 = vpop.permute.xlu0 %193 }
  0x89   :  { %vm199_vm5 = vcmp.eq.s32.totalorder %v545_v19, %v543_v18 }
  0x8a   :  { %vm556_vm8 = vmxor %vm199_vm5, %vm466_vm7 }
  0x8b   :  { %vm202_vm9 = vmand %vm556_vm8, %vm549_vm6 }
  0x8c   :  { %vm569_vm10 = vmand %vm199_vm5, %vm549_vm6 }
  0xe4   :  { %v173_v20 = vpop.f32.mrb[0].mxu0 }
  0xe5   :  { %v203_v21 = vsub.f32 1.25, %v173_v20  ;;  %v205_v22 = vadd.f32 0.25, %v173_v20  ;;  %v400_v23 = vpop.f32.mrb[1].mxu0  ;;  %v384_v26 = vadd.f32 -0.25, %v173_v20  ;;  %v383_v29 = vadd.f32 -0.75, %v173_v20 }
  0xe7   :  { %v204_v24 = vmax.f32 %v203_v21, 0.0  ;;  %v206_v25 = vmax.f32 %v205_v22, 0.0 }
  0xe9   :  { %v207_v28 = vsub.f32 0.0, %v204_v24  ;;  %v212_v30 = vmul.f32 %v384_v26, %v206_v25 }
  0xeb   :  { %v209_v32 = vmul.f32 %v383_v29, %v207_v28  ;;  %v213_v34 = vmul.f32 256.0, %v212_v30 }
  0xed   :  { %v210_v33 = vmul.f32 256.0, %v209_v32 }
  0xef   :  { %v214_v36 = vsel %vm199_vm5, %v210_v33, %v213_v34  ;;  %v303_v33 = vld [vmem:[#allocation3] sm:$0x1]  ;;  %v307_v34 = vld [vmem:[#allocation5] sm:$0x1] }
  0xf0   :  { %v228_v37 = vsel %vm202_vm9, %v214_v36, -inf  ;;  %v215_v38 = vsel %vm569_vm10, %v214_v36, -inf }
  0xf1   :  { %v229_v39 = vsel %vm216_vm11, %v228_v37, -inf  ;;  %v217_v40 = vsel %vm216_vm11, %v215_v38, -inf }
  0xf2   :  { %230 = vmax.xlane.f32.xlu1 %v229_v39  ;;  %218 = vmax.xlane.f32.xlu0 %v217_v40 }
 0x17f   :  { %v231_v42 = vpop.xlane.xlu1 %230  ;;  %v219_v43 = vpop.xlane.xlu0 %218 }
 0x180   :  { %v232_v44 = vrot.slane %v231_v42, 4  ;;  %v220_v45 = vrot.slane %v219_v43, 4 }
 0x182   :  { %v233_v46 = vmax.f32 %v231_v42, %v232_v44  ;;  %v221_v47 = vmax.f32 %v219_v43, %v220_v45 }
 0x184   :  { %v234_v48 = vrot.slane %v233_v46, 2  ;;  %v222_v49 = vrot.slane %v221_v47, 2 }
 0x186   :  { %v223_v50 = vmax.f32 %v221_v47, %v222_v49  ;;  %v235_v51 = vmax.f32 %v233_v46, %v234_v48 }
 0x188   :  { %v224_v52 = vrot.slane %v223_v50, 1  ;;  %v236_v53 = vrot.slane %v235_v51, 1 }
 0x18a   :  { %v225_v54 = vmax.f32 %v223_v50, %v224_v52  ;;  %v237_v55 = vmax.f32 %v235_v51, %v236_v53 }
 0x18c   :  { %407 = vpush %v225_v54 }
 0x18d   :  { %409 = vpush %v237_v55 }
 0x1bd   :  { %s408_s0 = spop %407 }
 0x1be   :  { %v227_v59 = vstv %s408_s0  ;;  %s410_s1 = spop %409 }
 0x1bf   :  { %v242_v60 = vmax.f32 %v240_v56, %v227_v59  ;;  %v239_v61 = vstv %s410_s1 }
 0x1c0   :  { %v243_v62 = vmax.f32 %v241_v57, %v239_v61 }
 0x1c1   :  { %v245_v63 = vsub.f32 %v240_v56, %v242_v60  ;;  %301 = vst.msk [vmem:[#allocation2] sm:$0x1] %vm93_vm0, %v242_v60  ;;  %v258_v0 = vrot.slane %v242_v60, %v257_v58  ;;  %vm244_vm12 = vcmp.eq.f32.partialorder %v242_v60, -inf }
 0x1c2   :  { %v250_v1 = vsub.f32 %v241_v57, %v243_v62  ;;  %302 = vst.msk [vmem:[#allocation4] sm:$0x1] %vm93_vm0, %v243_v62  ;;  %v267_v4 = vrot.slane %v243_v62, %v257_v58  ;;  %vm249_vm13 = vcmp.eq.f32.partialorder %v243_v62, -inf }
 0x1c3   :  { %v246_v2 = vmul.f32 1.442695, %v245_v63  ;;  %260 = vperm.xlu1 %423, %v258_v0  }
 0x1c4   :  { %v251_v3 = vmul.f32 1.442695, %v250_v1 }
 0x1c5   :  { %424 = vpow2.f32 %v246_v2 }
 0x1c6   :  { %426 = vpow2.f32 %v251_v3 }
 0x1c7   :  { %269 = vperm.xlu1 %423, %v267_v4  }
 0x1c8   :  { %v314_v46 = vld [vmem:[#allocation2] sm:$0x1] }
 0x1c9   :  { %v319_v49 = vld [vmem:[#allocation4] sm:$0x1] }
 0x1cf   :  { %v425_v5 = vpop.eup %424 }
 0x1d0   :  { %v427_v6 = vpop.eup %426  ;;  %v248_v7 = vsel %vm244_vm12, 0.0, %v425_v5 }
 0x1d1   :  { %v253_v8 = vsel %vm249_vm13, 0.0, %v427_v6  ;;  %v304_v35 = vmul.f32 %v303_v33, %v248_v7 }
 0x1d2   :  { %v308_v37 = vmul.f32 %v307_v34, %v253_v8 }
 0x242   :  { %v261_v9 = vpop.permute.xlu1 %260 }
 0x246   :  { %v270_v10 = vpop.permute.xlu1 %269 }
 0x247   :  { %v272_v11 = vsel %vm199_vm5, %v261_v9, %v270_v10 }
 0x248   :  { %v273_v12 = vsub.f32 %v214_v36, %v272_v11 }
 0x24a   :  { %v274_v13 = vmul.f32 1.442695, %v273_v12 }
 0x24c   :  { %428 = vpow2.f32 %v274_v13 }
 0x256   :  { %v429_v14 = vpop.eup %428 }
 0x257   :  { %v288_v15 = vsel %vm202_vm9, %v429_v14, 0.0  ;;  %v276_v16 = vsel %vm569_vm10, %v429_v14, 0.0 }
 0x258   :  { %v289_v17 = vsel %vm216_vm11, %v288_v15, 0.0  ;;  %v277_v20 = vsel %vm216_vm11, %v276_v16, 0.0 }
 0x259   :  { %290 = vadd.xlane.f32.xlu0 %v289_v17  ;;  %278 = vadd.xlane.f32.xlu1 %v277_v20 }
 0x2e6   :  { %v291_v18 = vpop.xlane.xlu0 %290  ;;  %v279_v19 = vpop.xlane.xlu1 %278 }
 0x2e7   :  { %v292_v21 = vrot.slane %v291_v18, 4  ;;  %v280_v22 = vrot.slane %v279_v19, 4 }
 0x2e9   :  { %v293_v23 = vadd.f32 %v292_v21, %v291_v18  ;;  %v281_v24 = vadd.f32 %v280_v22, %v279_v19 }
 0x2eb   :  { %v294_v25 = vrot.slane %v293_v23, 2  ;;  %v282_v26 = vrot.slane %v281_v24, 2 }
 0x2ed   :  { %v295_v27 = vadd.f32 %v294_v25, %v293_v23  ;;  %v283_v28 = vadd.f32 %v282_v26, %v281_v24 }
 0x2ef   :  { %v284_v29 = vrot.slane %v283_v28, 1  ;;  %v296_v30 = vrot.slane %v295_v27, 1 }
 0x2f1   :  { %v285_v31 = vadd.f32 %v284_v29, %v283_v28  ;;  %v297_v32 = vadd.f32 %v296_v30, %v295_v27 }
 0x2f3   :  { %411 = vpush %v285_v31 }
 0x2f4   :  { %413 = vpush %v297_v32 }
 0x324   :  { %s412_s4 = spop %411 }
 0x325   :  { %v287_v36 = vstv %s412_s4  ;;  %s414_s24 = spop %413 }
 0x326   :  { %v305_v38 = vadd.f32 %v304_v35, %v287_v36  ;;  %v299_v39 = vstv %s414_s24 }
 0x327   :  { %v309_v40 = vadd.f32 %v308_v37, %v299_v39 }
 0x328   :  { %306 = vst.msk [vmem:[#allocation3] sm:$0x1] %vm93_vm0, %v305_v38 }
 0x329   :  { %310 = vst.msk [vmem:[#allocation5] sm:$0x1] %vm93_vm0, %v309_v40 }
 0x32f   :  { %v315_v41 = vld [vmem:[#allocation3] sm:$0x1] }
 0x330   :  { %430 = vlog2.f32 %v315_v41  ;;  %v320_v42 = vld [vmem:[#allocation5] sm:$0x1] }
 0x331   :  { %432 = vlog2.f32 %v320_v42 }
 0x33a   :  { %v431_v43 = vpop.eup %430 }
 0x33b   :  { %v433_v44 = vpop.eup %432  ;;  %v317_v45 = vmul.f32 0.6931472, %v431_v43 }
 0x33c   :  { %v322_v47 = vmul.f32 0.6931472, %v433_v44 }
 0x33d   :  { %v318_v48 = vadd.f32 %v317_v45, %v314_v46 }
 0x33e   :  { %v323_v50 = vadd.f32 %v322_v47, %v319_v49 }
 0x340   :  { %v324_v51 = vadd.f32 %v323_v50, %v318_v48 }
 0x342   :  { %v326_v52 = vand.u32 2147483647, %v324_v51  ;;  %v325_v63 = vmax.f32 %v324_v51, 0.0 }
 0x344   :  { %v327_v53 = vsub.f32 0.0, %v326_v52 }
 0x346   :  { %v328_v54 = vmul.f32 1.442695, %v327_v53 }
 0x348   :  { %434 = vpow2.f32 %v328_v54 }
 0x352   :  { %v435_v55 = vpop.eup %434 }
 0x353   :  { %v330_v56 = vadd.f32 1.0, %v435_v55  ;;  %v333_v57 = vmul.f32 -0.5, %v435_v55  ;;  %v336_v59 = vand.u32 2147483647, %v435_v55 }
 0x355   :  { %436 = vlog2.f32 %v330_v56  ;;  %v334_v58 = vadd.f32 1.0, %v333_v57  ;;  %vm337_vm14 = vcmp.lt.f32.partialorder %v336_v59, 0.0004427343 }
 0x357   :  { %v335_v62 = vmul.f32 %v435_v55, %v334_v58 }
 0x35f   :  { %v437_v60 = vpop.eup %436 }
 0x360   :  { %v332_v61 = vmul.f32 0.6931472, %v437_v60 }
 0x362   :  { %v338_v0 = vsel %vm337_vm14, %v335_v62, %v332_v61 }
 0x363   :  { %v339_v1 = vadd.f32 %v338_v0, %v325_v63 }
 0x365   :  { %340 = vst.msk [vmem:[#allocation9] sm:$0x1] %vm93_vm0, %v339_v1 }
 0x366   :  { %449 = shalt.err (!%p446_p6)
}
 0x367   :  { %s450_s7 = scalar_lea.hbm %s623_s6, 16 }
 0x368   :  { %p451_p7 = scmp.ne.s32.totalorder %s623_s6, %s450_s7  ;;  %p454_p8 = scmp.lt.u32.totalorder %s450_s7, %s623_s6 }
 0x36a   :  { %p456_p9 = pnand %p454_p8, %p451_p7 }
 0x36c   :  { %459 = shalt.err (!%p456_p9)
}
 0x36d   :  { %350 = dma.vmem_to_hbm [thread:$0]  %s348_s26, 16, %s623_s6, [#allocation10]  }
 0x36e   :  { %460 = dma.done.wait [#allocation10], 16  }
 0x36f   :  { %461 = vsyncadd [#allocation10], 4294967280 }
 0x370   :  { %354 = vsyncpa [#allocation10], 1 }

</bundles_post_ra>
